<compile_context>
chip_gen: v5e
topology: v5e:2x2
jax: 0.10.0
libtpu: 0.0.40
codegen_flags: <defaults>
</compile_context>

<pallas_src>
import functools

import jax
import jax.numpy as jnp
from jax.experimental import pallas as pl
from jax.experimental.pallas import tpu as pltpu


def _linear_kernel(x_ref, w_ref, b_ref, o_ref, *, offset):
    # x_ref: (B_tile, D_in)   VMEM
    # w_ref: (D_in, D_out)    VMEM (pre-transposed; native MXU (M,K)@(K,N))
    # b_ref: (1, D_out)       VMEM (broadcast over batch)
    # o_ref: (B_tile, D_out)
    acc = jnp.dot(x_ref[...], w_ref[...], preferred_element_type=jnp.float32)
    out = acc + b_ref[...].astype(jnp.float32)
    if offset != 0.0:                      # static; traced away when 0
        out = out + jnp.float32(offset)
    o_ref[...] = out.astype(o_ref.dtype)


@functools.partial(jax.jit, static_argnames=("offset", "block_b", "small_b"))
def pallas_linear(x, w, b, *, offset=0.0, block_b=2048, small_b=4096):
    """x: (B, D_in) f32, w: (D_out, D_in) f32, b: (D_out,) f32 -> (B, D_out)."""
    B, D_in = x.shape
    D_out = w.shape[0]
    wt = w.T                      # (D_in, D_out); ~2 KB, one-time, feeds MXU directly
    b2 = b.reshape(1, D_out)      # TPU-friendly 2-D layout for broadcast
    kernel = functools.partial(_linear_kernel, offset=float(offset))
    vmem = pltpu.MemorySpace.VMEM

    if B <= small_b:
        # Minimal-overhead form: single invocation, whole arrays in VMEM.
        # Explicit VMEM limit sized to the actual buffers (+ headroom) so this
        # path fails loudly if shapes ever grow past what it can hold.
        needed = 4 * (B * D_in + D_in * D_out + D_out + B * D_out)
        vmem_limit = min(2 * needed + (8 << 20), 64 << 20)
        return pl.pallas_call(
            kernel,
            out_shape=jax.ShapeDtypeStruct((B, D_out), x.dtype),
            in_specs=[
                pl.BlockSpec(memory_space=vmem),
                pl.BlockSpec(memory_space=vmem),
                pl.BlockSpec(memory_space=vmem),
            ],
            out_specs=pl.BlockSpec(memory_space=vmem),
            compiler_params=pltpu.CompilerParams(vmem_limit_bytes=vmem_limit),
        )(x, wt, b2)

    # Large-batch path: ragged batch tiling (partial last block is masked by
    # Pallas; each row is independent so garbage OOB rows never reach output).
    grid = (pl.cdiv(B, block_b),)
    return pl.pallas_call(
        kernel,
        out_shape=jax.ShapeDtypeStruct((B, D_out), x.dtype),
        grid_spec=pltpu.PrefetchScalarGridSpec(
            num_scalar_prefetch=0,
            grid=grid,
            in_specs=[
                pl.BlockSpec((block_b, D_in), lambda i: (i, 0)),
                pl.BlockSpec((D_in, D_out), lambda i: (0, 0)),
                pl.BlockSpec((1, D_out), lambda i: (0, 0)),
            ],
            out_specs=pl.BlockSpec((block_b, D_out), lambda i: (i, 0)),
        ),
        compiler_params=pltpu.CompilerParams(
            dimension_semantics=("parallel",)),  # v7x 2-TC batch sharding
    )(x, wt, b2)


def pallas_linear_forward(x, w, b):
    return pallas_linear(x, w, b, offset=0.0)


def pallas_linear_generate(x, w, b):
    # PytorchLinearRegression.generate: linear(x) + 0.5, fused in-kernel.
    return pallas_linear(x, w, b, offset=0.5)


if __name__ == "__main__":
    input_dim, output_dim = 32, 16
    key = jax.random.PRNGKey(0)
    kx, kw, kb, kx2 = jax.random.split(key, 4)

    # Deterministic synthetic parameters (PyTorch inits uniformly; only
    # shapes/semantics matter here).
    w = jax.random.normal(kw, (output_dim, input_dim), dtype=jnp.float32) * 0.1
    b = jax.random.normal(kb, (output_dim,), dtype=jnp.float32) * 0.1

    # --- small batch: grid-less single-invocation path -----------------------
    batch = 8
    x = jax.random.normal(kx, (batch, input_dim), dtype=jnp.float32)
    out = jax.block_until_ready(pallas_linear_forward(x, w, b))
    ref = x @ w.T + b
    assert out.shape == (batch, output_dim)
    assert jnp.allclose(out, ref, atol=1e-5, rtol=1e-5)

    # generate(): +0.5 fused into the same kernel.
    gen = jax.block_until_ready(pallas_linear_generate(x, w, b))
    assert jnp.allclose(gen, ref + 0.5, atol=1e-5, rtol=1e-5)

    # --- ragged large batch: exercises the tiled grid path with a masked
    # partial last block (4100 rows, block_b=2048 -> 3 grid steps).
    big_batch = 4100
    xb = jax.random.normal(kx2, (big_batch, input_dim), dtype=jnp.float32)
    outb = jax.block_until_ready(pallas_linear_forward(xb, w, b))
    refb = xb @ w.T + b
    assert outb.shape == (big_batch, output_dim)
    assert jnp.allclose(outb, refb, atol=1e-4, rtol=1e-4)

    print("KERNEL_OK")
</pallas_src>

<mosaic_0001>
module attributes {stable_mosaic.version = 11 : i64} {
  func.func @_linear_kernel(%arg0: memref<8x32xf32, #tpu.memory_space<vmem>>, %arg1: memref<32x16xf32, #tpu.memory_space<vmem>>, %arg2: memref<1x16xf32, #tpu.memory_space<vmem>>, %arg3: memref<8x16xf32, #tpu.memory_space<vmem>>) attributes {dimension_semantics = [], scalar_prefetch = 0 : i64, scratch_operands = 0 : i64, tpu.core_type = #tpu.core_type<tc>} {
    %c0 = arith.constant 0 : index
    %c0_0 = arith.constant 0 : index
    %0 = vector.load %arg0[%c0, %c0_0] : memref<8x32xf32, #tpu.memory_space<vmem>>, vector<8x32xf32>
    %c0_1 = arith.constant 0 : index
    %c0_2 = arith.constant 0 : index
    %1 = vector.load %arg1[%c0_1, %c0_2] : memref<32x16xf32, #tpu.memory_space<vmem>>, vector<32x16xf32>
    %cst = arith.constant dense<0.000000e+00> : vector<8x16xf32>
    %2 = tpu.matmul %0, %1, %cst {dimension_numbers = #tpu.dot_dimension_numbers<[1], [0], [0], [1], [0, 0, 1, 1], [], []>} : vector<8x32xf32>, vector<32x16xf32>, vector<8x16xf32> -> vector<8x16xf32>
    %c0_3 = arith.constant 0 : index
    %c0_4 = arith.constant 0 : index
    %3 = vector.load %arg2[%c0_3, %c0_4] : memref<1x16xf32, #tpu.memory_space<vmem>>, vector<1x16xf32>
    %4 = vector.broadcast %3 : vector<1x16xf32> to vector<8x16xf32>
    %5 = arith.addf %2, %4 : vector<8x16xf32>
    %c0_5 = arith.constant 0 : index
    %c0_6 = arith.constant 0 : index
    %6 = vector.load %arg3[%c0_5, %c0_6] : memref<8x16xf32, #tpu.memory_space<vmem>>, vector<8x16xf32>
    tpu.vector_store %arg3[%c0_5, %c0_6], %5 {strides = array<i32>} : memref<8x16xf32, #tpu.memory_space<vmem>>, vector<8x16xf32>,
    return
  }
}

</mosaic_0001>

<bundles_post_ra>
// kernel: pallas_linear.1
= control target key start
LH: loop header
LB: loop body
LE: loop exit
PB: predicated region body
PF: predicated region fallthrough
CT: control target
= control target key end

     0   :  { %s137_s0 = inlined_call_operand.vmem [shape: f32[8,32], index: 0, kind: input, shape index: {}]   ;;  %s138_s1 = inlined_call_operand.vmem [shape: f32[32,16], index: 1, kind: input, shape index: {}]   ;;  %s139_s2 = inlined_call_operand.vmem [shape: f32[1,16], index: 2, kind: input, shape index: {}]   ;;  %s140_s3 = inlined_call_operand.hbm [shape: f32[8,16], index: 3, kind: output, shape index: {}]  }
   0x1   :  { %v19_v0 = vld [vmem:[%s138_s1 + $0x18] sm:$0xff]  ;;  %v18_v1 = vld [vmem:[%s138_s1 + $0x10] sm:$0xff]  ;;  %v17_v2 = vld [vmem:[%s138_s1 + $0x8] sm:$0xff] }
   0x2   :  { %40 = vmatpush.msra.mxu0 %v19_v0 }
   0x3   :  { %8 = vsyncpa [#allocation3], 0  ;;  %v16_v3 = vld [vmem:[%s138_s1] sm:$0xff]  ;;  %vm24_vm0 = vcmask 261120   ;;  %s95_s24 = smov [#allocation2]   ;;  %s57_s28 = sshll.u32 %s140_s3, 4  ;;  %s58_s28 = int_to_ptr.hbm [resolvable:$true] %s57_s28 }
   0x4   :  { %41 = vmatpush.msra.mxu0 %v18_v1  ;;  %v15_v4 = vld [vmem:[%s137_s0] sm:$0xff]  ;;  %s55_s25 = sshll.u32 %s95_s24, 4  ;;  %vm48_vm1 = vcmask 130048   ;;  %s56_s25 = int_to_ptr.vmem [resolvable:$true] %s55_s25 }
   0x5   :  { %v68_v5 = vld [vmem:[%s139_s2] ss:$0 sm:$0xff] }
   0x6   :  { %42 = vmatpush.msra.mxu0 %v17_v2 }
   0x8   :  { %43 = vmatpush.msra.mxu0 %v16_v3 }
   0x9   :  { %66 = vmatmul.msk.f32.vlgmr.msra.gmra.mxu0 %vm24_vm0, %v15_v4 }
  0x86   :  { %v45_v6 = vpop.f32.mrf.mxu0 }
  0x87   :  { %v46_v7 = vadd.f32 %v68_v5, %v45_v6 }
  0x89   :  { %49 = vst.msk [vmem:[#allocation2] sm:$0xff] %vm48_vm1, %v46_v7 }
  0x8a   :  { %60 = dma.vmem_to_hbm [thread:$0]  %s56_s25, 128, %s58_s28, [#allocation3]  }
  0x8b   :  { %93 = dma.done.wait [#allocation3], 128  }
  0x8c   :  { %94 = vsyncadd [#allocation3], 4294967168 }
  0x8d   :  { %65 = vsyncpa [#allocation3], 1 }

</bundles_post_ra>
